<compile_context>
chip_gen: v7x
topology: tpu7x:2x2x1
jax: 0.10.0
libtpu: 0.0.40
codegen_flags: <defaults>
</compile_context>

<pallas_src>
import jax
import jax.numpy as jnp
from jax import lax
from jax.experimental import pallas as pl
from jax.experimental.pallas import tpu as pltpu


def _spatial_transformer_kernel(src_ref, flow_ref, out_ref):
    # src_ref : (1, C*H, W)  -- all channels' image rows stacked along sublanes
    # flow_ref: (1, 2, TP)   -- (d_row, d_col) for TP flattened output pixels
    # out_ref : (1, C, TP)   -- lane-dense output tile
    C, TP = out_ref.shape[1], out_ref.shape[2]
    W = src_ref.shape[2]
    H = src_ref.shape[1] // C
    TH = TP // W                                   # whole image rows in this pixel tile

    # ---- sample coordinates: identity grid + displacement (f32 on the VPU) ----
    l = lax.broadcasted_iota(jnp.int32, (1, TP), 1).astype(jnp.float32)   # 0..TP-1
    r_loc = jnp.floor((l + 0.5) * (1.0 / float(W)))    # l // W  (exact: quotient < TH)
    c_loc = l - r_loc * float(W)                       # l %  W  (exact)
    base_row = (pl.program_id(1) * TH).astype(jnp.float32)

    fl = flow_ref[0].astype(jnp.float32)               # (2, TP)
    y = r_loc + base_row + fl[0:1, :]                  # sample row (pixel space)
    x = c_loc + fl[1:2, :]                             # sample col (pixel space)

    y0 = jnp.floor(y)
    x0 = jnp.floor(x)
    wy = y - y0                                        # fractional weights in [0, 1)
    wx = x - x0

    # ---- horizontal (W axis) bilinear gather as a one-hot matmul on the MXU ----
    # Bx[w, p] = (1-wx_p)*[w == x0_p] + wx_p*[w == x0_p + 1].  Out-of-range corner
    # columns never match any w -> grid_sample's zeros padding, no index aliasing.
    w_iota = lax.broadcasted_iota(jnp.int32, (W, TP), 0).astype(jnp.float32)
    bx = (jnp.where(w_iota == x0, 1.0 - wx, 0.0)
          + jnp.where(w_iota == x0 + 1.0, wx, 0.0))    # (W, TP)
    g = jnp.dot(src_ref[0].astype(jnp.float32), bx,
                preferred_element_type=jnp.float32)    # (C*H, TP)

    # ---- vertical (H axis) lerp: VPU multiply + cross-sublane reduce -----------
    h_iota = lax.broadcasted_iota(jnp.int32, (H, TP), 0).astype(jnp.float32)
    ay = (jnp.where(h_iota == y0, 1.0 - wy, 0.0)
          + jnp.where(h_iota == y0 + 1.0, wy, 0.0))    # (H, TP)

    for c in range(C):                 # C is small & static -> simple unrolled 2-D ops
        gc = g[c * H:(c + 1) * H, :]                   # (H, TP) static slice
        res = jnp.sum(gc * ay, axis=0, keepdims=True)  # (1, TP), lane-dense
        out_ref[0, c:c + 1, :] = res.astype(out_ref.dtype)


def _pick_row_tile(H, W, target_px=1024):
    """Largest whole-row strip (TH rows): TH | H, TH*W a multiple of 128 and <= target."""
    best = None
    for th in range(1, H + 1):
        if H % th != 0:
            continue
        tp = th * W
        if tp % 128 == 0 and tp <= target_px:
            best = th
    return best if best is not None else H   # fall back to the full image (block == full dim)


def spatial_transformer(src, flow, *, target_tile_px=1024):
    """Warp `src` (B, C, H, W) by displacement field `flow` (B, 2, H, W)."""
    B, C, H, W = src.shape
    assert flow.shape == (B, 2, H, W), "flow must be (B, 2, H, W)"
    HW = H * W

    TH = _pick_row_tile(H, W, target_tile_px)
    TP = TH * W                       # pixels per tile (multiple of 128, or the full image)
    n_pt = HW // TP

    src2 = src.reshape(B, C * H, W)   # channel-major row stack (free reshape)
    flow2 = flow.reshape(B, 2, HW)    # pixels flattened onto the lane axis

    cost = pl.CostEstimate(
        flops=2 * B * C * H * W * HW + 8 * B * HW * (H + W + C * H),
        transcendentals=0,
        bytes_accessed=(2 * src.size + flow.size) * src.dtype.itemsize,
    )

    out = pl.pallas_call(
        _spatial_transformer_kernel,
        out_shape=jax.ShapeDtypeStruct((B, C, HW), src.dtype),
        grid_spec=pltpu.PrefetchScalarGridSpec(
            num_scalar_prefetch=0,
            grid=(B, n_pt),
            in_specs=[
                # src stays resident per batch (same block for every pixel tile)
                pl.BlockSpec((1, C * H, W), lambda b, p: (b, 0, 0)),
                pl.BlockSpec((1, 2, TP), lambda b, p: (b, 0, p)),
            ],
            out_specs=pl.BlockSpec((1, C, TP), lambda b, p: (b, 0, p)),
        ),
        compiler_params=pltpu.CompilerParams(
            dimension_semantics=("parallel", "parallel")),
        cost_estimate=cost,
    )(src2, flow2)
    return out.reshape(B, C, H, W)


def _reference(src, flow):
    """Pure-JAX (XLA) reference: grid_sample(bilinear, align_corners=True, zeros padding)."""
    B, C, H, W = src.shape
    f = flow.astype(jnp.float32)
    y = jnp.arange(H, dtype=jnp.float32)[None, :, None] + f[:, 0]
    x = jnp.arange(W, dtype=jnp.float32)[None, None, :] + f[:, 1]
    y0 = jnp.floor(y)
    x0 = jnp.floor(x)
    wy = y - y0
    wx = x - x0
    src_flat = src.astype(jnp.float32).reshape(B, C, H * W)

    def corner(yc, xc, w):
        valid = (yc >= 0) & (yc <= H - 1) & (xc >= 0) & (xc <= W - 1)
        yi = jnp.clip(yc, 0, H - 1).astype(jnp.int32)
        xi = jnp.clip(xc, 0, W - 1).astype(jnp.int32)
        idx = jnp.broadcast_to((yi * W + xi).reshape(B, 1, H * W), (B, C, H * W))
        vals = jnp.take_along_axis(src_flat, idx, axis=2).reshape(B, C, H, W)
        return vals * (w * valid.astype(jnp.float32))[:, None]

    out = (corner(y0, x0, (1.0 - wy) * (1.0 - wx))
           + corner(y0, x0 + 1.0, (1.0 - wy) * wx)
           + corner(y0 + 1.0, x0, wy * (1.0 - wx))
           + corner(y0 + 1.0, x0 + 1.0, wy * wx))
    return out.astype(src.dtype)


if __name__ == "__main__":
    B, C, H, W = 2, 4, 16, 16
    key = jax.random.PRNGKey(0)
    k_src, k_flow = jax.random.split(key)
    src = jax.random.normal(k_src, (B, C, H, W), dtype=jnp.float32)
    # small displacements (a few pixels), including some that push out of bounds
    flow = 2.0 * jax.random.normal(k_flow, (B, 2, H, W), dtype=jnp.float32)

    out = spatial_transformer(src, flow)
    out = jax.block_until_ready(out)
    assert out.shape == (B, C, H, W)

    ref = _reference(src, flow)
    max_err = float(jnp.max(jnp.abs(out - ref)))
    assert max_err < 1e-3, f"max abs error vs reference: {max_err}"
    print("KERNEL_OK")
</pallas_src>

<mosaic_0001>
module attributes {stable_mosaic.version = 11 : i64} {
  func.func @_spatial_transformer_kernel(%arg0: i32, %arg1: i32, %arg2: memref<1x64x16xf32, #tpu.memory_space<vmem>>, %arg3: memref<1x2x256xf32, #tpu.memory_space<vmem>>, %arg4: memref<1x4x256xf32, #tpu.memory_space<vmem>>) attributes {dimension_semantics = [#tpu.dimension_semantics<parallel>, #tpu.dimension_semantics<parallel>], iteration_bounds = array<i64: 2, 1>, scalar_prefetch = 0 : i64, scratch_operands = 0 : i64, tpu.core_type = #tpu.core_type<tc>, window_params = [{transform_indices = @transform_0, window_bounds = array<i64: 1, 64, 16>}, {transform_indices = @transform_1, window_bounds = array<i64: 1, 2, 256>}, {transform_indices = @transform_2, window_bounds = array<i64: 1, 4, 256>}]} {
    %0 = tpu.iota {dimensions = array<i32: 1>} : vector<1x256xi32>
    %1 = arith.sitofp %0 : vector<1x256xi32> to vector<1x256xf32>
    %cst = arith.constant 5.000000e-01 : f32
    %2 = vector.broadcast %cst : f32 to vector<1x256xf32>
    %3 = arith.addf %1, %2 : vector<1x256xf32>
    %cst_0 = arith.constant 6.250000e-02 : f32
    %4 = vector.broadcast %cst_0 : f32 to vector<1x256xf32>
    %5 = arith.mulf %3, %4 : vector<1x256xf32>
    %6 = math.floor %5 : vector<1x256xf32>
    %cst_1 = arith.constant 1.600000e+01 : f32
    %7 = vector.broadcast %cst_1 : f32 to vector<1x256xf32>
    %8 = arith.mulf %6, %7 : vector<1x256xf32>
    %9 = arith.subf %1, %8 : vector<1x256xf32>
    %c16_i32 = arith.constant 16 : i32
    %10 = arith.muli %arg1, %c16_i32 : i32
    %11 = arith.sitofp %10 : i32 to f32
    %c0 = arith.constant 0 : index
    %c0_2 = arith.constant 0 : index
    %c0_3 = arith.constant 0 : index
    %12 = vector.load %arg3[%c0, %c0_2, %c0_3] : memref<1x2x256xf32, #tpu.memory_space<vmem>>, vector<1x2x256xf32>
    %13 = vector.shape_cast %12 : vector<1x2x256xf32> to vector<2x256xf32>
    %14 = vector.broadcast %11 : f32 to vector<1x256xf32>
    %15 = arith.addf %6, %14 : vector<1x256xf32>
    %16 = vector.extract_strided_slice %13 {offsets = [0, 0], sizes = [1, 256], strides = [1, 1]} : vector<2x256xf32> to vector<1x256xf32>
    %17 = arith.addf %15, %16 : vector<1x256xf32>
    %18 = vector.extract_strided_slice %13 {offsets = [1, 0], sizes = [1, 256], strides = [1, 1]} : vector<2x256xf32> to vector<1x256xf32>
    %19 = arith.addf %9, %18 : vector<1x256xf32>
    %20 = math.floor %17 : vector<1x256xf32>
    %21 = math.floor %19 : vector<1x256xf32>
    %22 = arith.subf %17, %20 : vector<1x256xf32>
    %23 = arith.subf %19, %21 : vector<1x256xf32>
    %24 = tpu.iota {dimensions = array<i32: 0>} : vector<16x256xi32>
    %25 = arith.sitofp %24 : vector<16x256xi32> to vector<16x256xf32>
    %26 = vector.broadcast %21 : vector<1x256xf32> to vector<16x256xf32>
    %27 = arith.cmpf oeq, %25, %26 : vector<16x256xf32>
    %cst_4 = arith.constant 1.000000e+00 : f32
    %28 = vector.broadcast %cst_4 : f32 to vector<1x256xf32>
    %29 = arith.subf %28, %23 : vector<1x256xf32>
    %cst_5 = arith.constant 0.000000e+00 : f32
    %30 = vector.shape_cast %29 : vector<1x256xf32> to vector<1x256xf32>
    %31 = vector.broadcast %30 : vector<1x256xf32> to vector<16x256xf32>
    %32 = vector.broadcast %cst_5 : f32 to vector<16x256xf32>
    %33 = arith.select %27, %31, %32 : vector<16x256xi1>, vector<16x256xf32>
    %cst_6 = arith.constant 1.000000e+00 : f32
    %34 = vector.broadcast %cst_6 : f32 to vector<1x256xf32>
    %35 = arith.addf %21, %34 : vector<1x256xf32>
    %36 = vector.broadcast %35 : vector<1x256xf32> to vector<16x256xf32>
    %37 = arith.cmpf oeq, %25, %36 : vector<16x256xf32>
    %cst_7 = arith.constant 0.000000e+00 : f32
    %38 = vector.shape_cast %23 : vector<1x256xf32> to vector<1x256xf32>
    %39 = vector.broadcast %38 : vector<1x256xf32> to vector<16x256xf32>
    %40 = vector.broadcast %cst_7 : f32 to vector<16x256xf32>
    %41 = arith.select %37, %39, %40 : vector<16x256xi1>, vector<16x256xf32>
    %42 = arith.addf %33, %41 : vector<16x256xf32>
    %c0_8 = arith.constant 0 : index
    %c0_9 = arith.constant 0 : index
    %c0_10 = arith.constant 0 : index
    %43 = vector.load %arg2[%c0_8, %c0_9, %c0_10] : memref<1x64x16xf32, #tpu.memory_space<vmem>>, vector<1x64x16xf32>
    %44 = vector.shape_cast %43 : vector<1x64x16xf32> to vector<64x16xf32>
    %cst_11 = arith.constant dense<0.000000e+00> : vector<64x256xf32>
    %45 = tpu.matmul %44, %42, %cst_11 {dimension_numbers = #tpu.dot_dimension_numbers<[1], [0], [0], [1], [0, 0, 1, 1], [], []>} : vector<64x16xf32>, vector<16x256xf32>, vector<64x256xf32> -> vector<64x256xf32>
    %46 = tpu.iota {dimensions = array<i32: 0>} : vector<16x256xi32>
    %47 = arith.sitofp %46 : vector<16x256xi32> to vector<16x256xf32>
    %48 = vector.broadcast %20 : vector<1x256xf32> to vector<16x256xf32>
    %49 = arith.cmpf oeq, %47, %48 : vector<16x256xf32>
    %cst_12 = arith.constant 1.000000e+00 : f32
    %50 = vector.broadcast %cst_12 : f32 to vector<1x256xf32>
    %51 = arith.subf %50, %22 : vector<1x256xf32>
    %cst_13 = arith.constant 0.000000e+00 : f32
    %52 = vector.shape_cast %51 : vector<1x256xf32> to vector<1x256xf32>
    %53 = vector.broadcast %52 : vector<1x256xf32> to vector<16x256xf32>
    %54 = vector.broadcast %cst_13 : f32 to vector<16x256xf32>
    %55 = arith.select %49, %53, %54 : vector<16x256xi1>, vector<16x256xf32>
    %cst_14 = arith.constant 1.000000e+00 : f32
    %56 = vector.broadcast %cst_14 : f32 to vector<1x256xf32>
    %57 = arith.addf %20, %56 : vector<1x256xf32>
    %58 = vector.broadcast %57 : vector<1x256xf32> to vector<16x256xf32>
    %59 = arith.cmpf oeq, %47, %58 : vector<16x256xf32>
    %cst_15 = arith.constant 0.000000e+00 : f32
    %60 = vector.shape_cast %22 : vector<1x256xf32> to vector<1x256xf32>
    %61 = vector.broadcast %60 : vector<1x256xf32> to vector<16x256xf32>
    %62 = vector.broadcast %cst_15 : f32 to vector<16x256xf32>
    %63 = arith.select %59, %61, %62 : vector<16x256xi1>, vector<16x256xf32>
    %64 = arith.addf %55, %63 : vector<16x256xf32>
    %65 = vector.extract_strided_slice %45 {offsets = [0, 0], sizes = [16, 256], strides = [1, 1]} : vector<64x256xf32> to vector<16x256xf32>
    %66 = arith.mulf %65, %64 : vector<16x256xf32>
    %cst_16 = arith.constant dense<0.000000e+00> : vector<256xf32>
    %67 = vector.multi_reduction <add>, %66, %cst_16 [0] : vector<16x256xf32> to vector<256xf32>
    %68 = vector.shape_cast %67 : vector<256xf32> to vector<1x256xf32>
    %c0_17 = arith.constant 0 : index
    %c0_18 = arith.constant 0 : index
    %c0_19 = arith.constant 0 : index
    %69 = vector.load %arg4[%c0_17, %c0_18, %c0_19] : memref<1x4x256xf32, #tpu.memory_space<vmem>>, vector<1x1x256xf32>
    %70 = vector.shape_cast %69 : vector<1x1x256xf32> to vector<1x256xf32>
    %71 = vector.shape_cast %68 : vector<1x256xf32> to vector<1x1x256xf32>
    tpu.vector_store %arg4[%c0_17, %c0_18, %c0_19], %71 {strides = array<i32>} : memref<1x4x256xf32, #tpu.memory_space<vmem>>, vector<1x1x256xf32>,
    %72 = vector.extract_strided_slice %45 {offsets = [16, 0], sizes = [16, 256], strides = [1, 1]} : vector<64x256xf32> to vector<16x256xf32>
    %73 = arith.mulf %72, %64 : vector<16x256xf32>
    %cst_20 = arith.constant dense<0.000000e+00> : vector<256xf32>
    %74 = vector.multi_reduction <add>, %73, %cst_20 [0] : vector<16x256xf32> to vector<256xf32>
    %75 = vector.shape_cast %74 : vector<256xf32> to vector<1x256xf32>
    %c0_21 = arith.constant 0 : index
    %c1 = arith.constant 1 : index
    %c0_22 = arith.constant 0 : index
    %76 = vector.load %arg4[%c0_21, %c1, %c0_22] : memref<1x4x256xf32, #tpu.memory_space<vmem>>, vector<1x1x256xf32>
    %77 = vector.shape_cast %76 : vector<1x1x256xf32> to vector<1x256xf32>
    %78 = vector.shape_cast %75 : vector<1x256xf32> to vector<1x1x256xf32>
    tpu.vector_store %arg4[%c0_21, %c1, %c0_22], %78 {strides = array<i32>} : memref<1x4x256xf32, #tpu.memory_space<vmem>>, vector<1x1x256xf32>,
    %79 = vector.extract_strided_slice %45 {offsets = [32, 0], sizes = [16, 256], strides = [1, 1]} : vector<64x256xf32> to vector<16x256xf32>
    %80 = arith.mulf %79, %64 : vector<16x256xf32>
    %cst_23 = arith.constant dense<0.000000e+00> : vector<256xf32>
    %81 = vector.multi_reduction <add>, %80, %cst_23 [0] : vector<16x256xf32> to vector<256xf32>
    %82 = vector.shape_cast %81 : vector<256xf32> to vector<1x256xf32>
    %c0_24 = arith.constant 0 : index
    %c2 = arith.constant 2 : index
    %c0_25 = arith.constant 0 : index
    %83 = vector.load %arg4[%c0_24, %c2, %c0_25] : memref<1x4x256xf32, #tpu.memory_space<vmem>>, vector<1x1x256xf32>
    %84 = vector.shape_cast %83 : vector<1x1x256xf32> to vector<1x256xf32>
    %85 = vector.shape_cast %82 : vector<1x256xf32> to vector<1x1x256xf32>
    tpu.vector_store %arg4[%c0_24, %c2, %c0_25], %85 {strides = array<i32>} : memref<1x4x256xf32, #tpu.memory_space<vmem>>, vector<1x1x256xf32>,
    %86 = vector.extract_strided_slice %45 {offsets = [48, 0], sizes = [16, 256], strides = [1, 1]} : vector<64x256xf32> to vector<16x256xf32>
    %87 = arith.mulf %86, %64 : vector<16x256xf32>
    %cst_26 = arith.constant dense<0.000000e+00> : vector<256xf32>
    %88 = vector.multi_reduction <add>, %87, %cst_26 [0] : vector<16x256xf32> to vector<256xf32>
    %89 = vector.shape_cast %88 : vector<256xf32> to vector<1x256xf32>
    %c0_27 = arith.constant 0 : index
    %c3 = arith.constant 3 : index
    %c0_28 = arith.constant 0 : index
    %90 = vector.load %arg4[%c0_27, %c3, %c0_28] : memref<1x4x256xf32, #tpu.memory_space<vmem>>, vector<1x1x256xf32>
    %91 = vector.shape_cast %90 : vector<1x1x256xf32> to vector<1x256xf32>
    %92 = vector.shape_cast %89 : vector<1x256xf32> to vector<1x1x256xf32>
    tpu.vector_store %arg4[%c0_27, %c3, %c0_28], %92 {strides = array<i32>} : memref<1x4x256xf32, #tpu.memory_space<vmem>>, vector<1x1x256xf32>,
    return
  }
  func.func @transform_0(%arg0: i32, %arg1: i32) -> (i32, i32, i32) {
    %c0_i32 = arith.constant 0 : i32
    %c0_i32_0 = arith.constant 0 : i32
    %c0_i32_1 = arith.constant 0 : i32
    return %arg0, %c0_i32, %c0_i32_0 : i32, i32, i32
  }
  func.func @transform_1(%arg0: i32, %arg1: i32) -> (i32, i32, i32) {
    %c0_i32 = arith.constant 0 : i32
    %c0_i32_0 = arith.constant 0 : i32
    return %arg0, %c0_i32, %arg1 : i32, i32, i32
  }
  func.func @transform_2(%arg0: i32, %arg1: i32) -> (i32, i32, i32) {
    %c0_i32 = arith.constant 0 : i32
    %c0_i32_0 = arith.constant 0 : i32
    return %arg0, %c0_i32, %arg1 : i32, i32, i32
  }
}

</mosaic_0001>

<bundles_post_ra>
// kernel: tpu_custom_call.1
= control target key start
LH: loop header
LB: loop body
LE: loop exit
PB: predicated region body
PF: predicated region fallthrough
CT: control target
= control target key end

     0   :  { %7 = vsyncpa [#allocation3], 0  ;;  %s1200_s0 = inlined_call_operand.vmem [shape: f32[2,64,16], index: 0, kind: input, shape index: {}]   ;;  %s1201_s1 = inlined_call_operand.vmem [shape: f32[2,2,256], index: 1, kind: input, shape index: {}]   ;;  %s1202_s2 = inlined_call_operand.hbm [shape: f32[2,4,256], index: 2, kind: output, shape index: {}]  }
   0x1   :  { %9 = vsyncpa [#allocation3 + $0x1], 0  ;;  %s960_s9 = smov 0   ;;  %s962_s10 = smov 0  }
   0x2   :  { %s964_s11 = smov 0   ;;  %s966_s12 = smov 0  }
   0x3   :  { %s968_s13 = smov 0   ;;  %s970_s14 = smov 0  }
   0x4 LB: > { %s770_s15 = sadd.s32 4294967295, %s940_s14   ;;  %s771_s16 = sadd.s32 4294967294, %s940_s14   ;;  %s940_s14 = sphi %s970_s14, %s15_s14   ;;  %s936_s13 = sphi %s968_s13, %s1211_s13   ;;  %s932_s12 = sphi %s966_s12, %s1210_s12   ;;  %s928_s11 = sphi %s964_s11, %s1209_s11   ;;  %s924_s10 = sphi %s962_s10, %s1208_s10   ;;  %s920_s9 = sphi %s960_s9, %s1207_s9  }
   0x5   : > { %s27_s17 = sadd.s32 1, %s936_s13  ;;  %s90_s18 = sadd.s32 1, %s928_s11 }
   0x6   : > { %p29_p0 = scmp.ge.s32.totalorder %s27_s17, 2  ;;  %p100_p1 = scmp.ne.s32.totalorder %s928_s11, %s924_s10 }
   0x7   : > { %p101_p2 = scmp.eq.s32.totalorder %s770_s15, 1  ;;  %p106_p3 = scmp.ne.s32.totalorder %s924_s10, %s920_s9 }
   0x8   : > { %s1213_s17 = smov (%p29_p0, %s27_s17), 0  ;;  %p107_p5 = scmp.eq.s32.totalorder %s771_s16, 1 }
   0x9   : > { %p1000_p4 = por %p101_p2, %p100_p1  ;;  %s85_s20 = ssub.s32 %s936_s13, %s1213_s17 }
   0xa   : > { %p774_p6 = scmp.ge.s32.totalorder %s940_s14, 1  ;;  %p88_p7 = scmp.eq.s32.totalorder %s85_s20, 0 }
   0xb   : > { %p1007_p8 = por %p107_p5, %p106_p3  ;;  %p146_p9 = scmp.lt.s32.totalorder %s940_s14, 3 }
   0xc   : > { %s1013_s22 = scalar_select %p88_p7, %s928_s11, %s90_s18  }
   0xd   : > { %p147_p10 = pnand %p774_p6, %p146_p9 }
   0xe   : > { %p177_p11 = scmp.lt.s32.totalorder (!%p147_p10), %s932_s12, 1  ;;  %v193_v0 = vlaneseq (!%p147_p10)  ;;  %v942_v1 = vmov (!%p147_p10), 0.0   ;;  %vm316_vm8 = vcmask (!%p147_p10), 130048   ;;  %s174_s4 = sand.u32 (!%p147_p10), 1, %s924_s10  }
   0xf   : > { %150 = sbr.rel (%p147_p10) target bundleno = 312 (0x138), region = 28  ;;  %405 = vmatprep.mubr.f32.mxu0 (!%p147_p10), %v942_v1  ;;  %429 = vmatprep.mubr.f32.mxu1 (!%p147_p10), %v942_v1  ;;  %s775_s5 = sshll.u32 (!%p147_p10), %s174_s4, 3 }
  0x10   : > { %v194_v2 = vand.u32 (!%p147_p10), 127, %v193_v0  ;;  %v1024_v4 = vshrl.u32 (!%p147_p10), %v193_v0, 7  ;;  %s176_s6 = scalar_lea.vmem (!%p147_p10), [#allocation2], %s775_s5  ;;  %s798_s7 = sshll.u32 (!%p147_p10), %s932_s12, 7 }
  0x11   : > { %s682_s8 = sshll.u32 (!%p147_p10), %s176_s6, 4  ;;  %s1147_s18 = scalar_lea.hbm (!%p147_p10), %s1202_s2, %s798_s7  ;;  %s1149_s8 = int_to_ptr.vmem [resolvable:$true] %s682_s8 }
  0x12   : > { %v195_v3 = vadd.s32 (!%p147_p10), 128, %v194_v2  ;;  %v196_v5 = vcvt.s32.f32 (!%p147_p10), %v194_v2  ;;  %v229_v10 = vsub.s32 (!%p147_p10), 1, %v1024_v4  ;;  %v233_v13 = vsub.s32 (!%p147_p10), 3, %v1024_v4  ;;  %s862_s20 = scalar_lea.vmem (!%p147_p10), %s1149_s8, 128 }
  0x13   : > { %v249_v20 = vadd.s32 (!%p147_p10), 8, %v1024_v4  ;;  %v1047_v23 = vsub.s32 (!%p147_p10), 0, %v1024_v4  ;;  %v1050_v26 = vcvt.s32.f32 (!%p147_p10), %v1024_v4  ;;  %p863_p12 = scmp.ne.s32.totalorder (!%p147_p10), %s1149_s8, %s862_s20 }
  0x14   : > { %v197_v6 = vcvt.s32.f32 (!%p147_p10), %v195_v3  ;;  %v198_v7 = vadd.f32 (!%p147_p10), 0.5, %v196_v5 }
  0x15   : > { %v1052_v27 = vcvt.s32.f32 (!%p147_p10), %v249_v20  ;;  %p864_p13 = pnand (!%p147_p10), %p863_p12, %p1000_p4 }
  0x16   : > { %s1019_s23 = scalar_select %p177_p11, %s932_s12, 1  ;;  %v199_v8 = vadd.f32 0.5, %v197_v6  ;;  %v1029_v9 = vmul.f32 0.0625, %v198_v7 }
  0x17   : > { %s666_s12 = scalar_lea.sflag [#allocation3], %s174_s4  ;;  %p865_p0 = pneg %p864_p13 }
  0x18   : > { %s797_s24 = sshll.u32 %s1019_s23, 2  ;;  %v1032_v11 = vmul.f32 0.0625, %v199_v8  ;;  %v202_v14 = vfloor.f32 %v1029_v9  ;;  %s796_s28 = sshll.u32 %s1019_s23, 6 }
  0x19   : > { %s190_s27 = scalar_lea.vmem %s1201_s1, %s797_s24  ;;  %s181_s3 = scalar_lea.vmem %s1200_s0, %s796_s28 }
  0x1a   : > { %v1034_v12 = vld [vmem:[%s190_s27] sm:$0xf]  ;;  %v203_v15 = vfloor.f32 %v1032_v11  ;;  %v204_v16 = vmul.f32 16.0, %v202_v14  ;;  %v309_v60 = vld [vmem:[%s181_s3 + $0x8] sm:$0xff]  ;;  %v310_v62 = vld [vmem:[%s181_s3 + $0x10] sm:$0xff]  ;;  %s944_s23 = smov [#allocation2]  }
  0x1b   : > { %v230_v17 = vrot.slane %v1034_v12, %v229_v10  ;;  %v234_v19 = vrot.slane %v1034_v12, %v233_v13  ;;  %v308_v58 = vld [vmem:[%s181_s3] sm:$0xff]  ;;  %v313_v61 = vld [vmem:[%s181_s3 + $0x28] sm:$0xff]  ;;  %v314_v63 = vld [vmem:[%s181_s3 + $0x30] sm:$0xff]  ;;  %s866_s24 = sshll.u32 %s944_s23, 4  ;;  %s867_s24 = int_to_ptr.vmem [resolvable:$false] %s866_s24 }
  0x1c   : > { %v205_v18 = vmul.f32 16.0, %v203_v15  ;;  %v206_v21 = vsub.f32 %v196_v5, %v204_v16  ;;  %v312_v59 = vld [vmem:[%s181_s3 + $0x20] sm:$0xff]  ;;  %v311_v2 = vld [vmem:[%s181_s3 + $0x18] sm:$0xff]  ;;  %v218_v5 = vrot.slane %v1034_v12, %v1047_v23  ;;  %s868_s25 = scalar_lea.vmem %s867_s24, 256  ;;  %p869_p1 = scmp.lt.s32.totalorder %s1149_s8, %s867_s24 }
  0x1d   : > { %v315_v3 = vld [vmem:[%s181_s3 + $0x38] sm:$0xff]  ;;  %p870_p2 = scmp.lt.s32.totalorder %s868_s25, %s862_s20 }
  0x1e   : > { %v207_v22 = vsub.f32 %v197_v6, %v205_v18  ;;  %v237_v24 = vadd.f32 %v230_v17, %v206_v21  ;;  %v221_v6 = vsub.s32 2, %v1024_v4  ;;  %v225_v7 = vadd.f32 %v218_v5, %v202_v14 }
  0x1f   : > { %p871_p3 = por %p870_p2, %p869_p1 }
  0x20   : > { %v238_v25 = vadd.f32 %v234_v19, %v207_v22  ;;  %v241_v28 = vfloor.f32 %v237_v24  ;;  %v222_v8 = vrot.slane %v1034_v12, %v221_v6  ;;  %v239_v10 = vfloor.f32 %v225_v7 }
  0x21   : > { %p872_p5 = pnand %p871_p3, %p865_p0 }
  0x22   : > { %v242_v29 = vfloor.f32 %v238_v25  ;;  %v245_v30 = vsub.f32 %v237_v24, %v241_v28  ;;  %v255_v31 = vrot.slane %v241_v28, %v1047_v23  ;;  %v278_v32 = vadd.f32 1.0, %v241_v28 }
  0x23   : > { %v243_v13 = vsub.f32 %v225_v7, %v239_v10  ;;  %v480_v16 = vadd.f32 1.0, %v239_v10  ;;  %v457_v19 = vrot.slane %v239_v10, %v1047_v23 }
  0x24   : > { %v246_v33 = vsub.f32 %v238_v25, %v242_v29  ;;  %v259_v34 = vrot.slane %v242_v29, %v1047_v23  ;;  %v279_v35 = vadd.f32 1.0, %v242_v29  ;;  %vm260_vm0 = vcmp.eq.f32.partialorder %v1050_v26, %v255_v31 }
  0x25   : > { %vm262_vm1 = vcmp.eq.f32.partialorder %v1052_v27, %v255_v31  ;;  %v264_v36 = vsub.f32 1.0, %v245_v30  ;;  %v283_v37 = vrot.slane %v278_v32, %v1047_v23  ;;  %v295_v43 = vrot.slane %v245_v30, %v1047_v23 }
  0x26   : > { %vm261_vm2 = vcmp.eq.f32.partialorder %v1050_v26, %v259_v34  ;;  %vm263_vm3 = vcmp.eq.f32.partialorder %v1052_v27, %v259_v34  ;;  %v265_v38 = vsub.f32 1.0, %v246_v33  ;;  %v287_v39 = vrot.slane %v279_v35, %v1047_v23 }
  0x27   : > { %v299_v40 = vrot.slane %v246_v33, %v1047_v23  ;;  %v269_v41 = vrot.slane %v264_v36, %v1047_v23  ;;  %vm288_vm4 = vcmp.eq.f32.partialorder %v1050_v26, %v283_v37  ;;  %vm290_vm5 = vcmp.eq.f32.partialorder %v1052_v27, %v283_v37 }
  0x28   : > { %v273_v42 = vrot.slane %v265_v38, %v1047_v23  ;;  %vm289_vm6 = vcmp.eq.f32.partialorder %v1050_v26, %v287_v39  ;;  %vm291_vm7 = vcmp.eq.f32.partialorder %v1052_v27, %v287_v39  ;;  %v300_v50 = vsel %vm288_vm4, %v295_v43, 0.0 }
  0x29   : > { %v301_v44 = vsel %vm289_vm6, %v299_v40, 0.0  ;;  %v303_v45 = vsel %vm291_vm7, %v299_v40, 0.0  ;;  %v274_v46 = vsel %vm260_vm0, %v269_v41, 0.0  ;;  %v276_v47 = vsel %vm262_vm1, %v269_v41, 0.0 }
  0x2a   : > { %v275_v48 = vsel %vm261_vm2, %v273_v42, 0.0  ;;  %v277_v49 = vsel %vm263_vm3, %v273_v42, 0.0  ;;  %v302_v51 = vsel %vm290_vm5, %v295_v43, 0.0  ;;  %v304_v54 = vadd.f32 %v300_v50, %v274_v46 }
  0x2b   : > { %v305_v52 = vadd.f32 %v301_v44, %v275_v48  ;;  %v307_v53 = vadd.f32 %v303_v45, %v277_v49  ;;  %v306_v55 = vadd.f32 %v302_v51, %v276_v47  ;;  %v466_v18 = vsub.f32 1.0, %v243_v13 }
  0x2c   : > { %v485_v20 = vrot.slane %v480_v16, %v1047_v23  ;;  %v497_v9 = vrot.slane %v243_v13, %v1047_v23  ;;  %vm462_vm9 = vcmp.eq.f32.partialorder %v1050_v26, %v457_v19  ;;  %vm464_vm11 = vcmp.eq.f32.partialorder %v1052_v27, %v457_v19 }
  0x2d   : > { %v799_v56 = vpack.c.bf16 %v307_v53, %v305_v52  ;;  %v801_v57 = vpack.c.bf16 %v306_v55, %v304_v54  ;;  %v471_v24 = vrot.slane %v466_v18, %v1047_v23  ;;  %v943_v44 = vmov 1966171168  }
  0x2e   : > { %vm490_vm10 = vcmp.eq.f32.partialorder %v1050_v26, %v485_v20  ;;  %vm492_vm12 = vcmp.eq.f32.partialorder %v1052_v27, %v485_v20  ;;  %v532_v45 = vunpack.c.l.s4 %v943_v44  ;;  %vm1129_vm1 = vcmp.lt.s32.totalorder %v193_v0, 256 }
  0x2f   : > { %800 = vmatprep.subr.bf16.mxu0 %v799_v56  ;;  %803 = vmatprep.subr.bf16.mxu1 %v799_v56  ;;  %v502_v25 = vsel %vm490_vm10, %v497_v9, 0.0  ;;  %v478_v31 = vsel %vm464_vm11, %v471_v24, 0.0  ;;  %v504_v32 = vsel %vm492_vm12, %v497_v9, 0.0 }
  0x30   : > { %802 = vmatpush1.bf16.msra.mxu0 %v801_v57  ;;  %804 = vmatpush1.bf16.msra.mxu1 %v801_v57  ;;  %v508_v42 = vadd.f32 %v504_v32, %v478_v31  ;;  %v533_v57 = vunpack.c.0.s8 %v532_v45 }
  0x32   : > { %v1121_v13 = vsub.s32 %v533_v57, %v1024_v4 }
  0x33   : > { %780 = vmatmul.mubr.msk.f32.vlgmr.msra.gmra.mrb[0].mxu0 %vm316_vm8, %v308_v58  ;;  %784 = vmatmul.mubr.msk.f32.vlgmr.msra.gmra.mrb[0].mxu1 %vm316_vm8, %v312_v59 }
  0x34   : > { %411 = vmatprep.mubr.f32.mxu0 %v942_v1  ;;  %435 = vmatprep.mubr.f32.mxu1 %v942_v1 }
  0x37   : > { %781 = vmatmul.mubr.msk.f32.gmra.mrb[2].mxu0 %vm316_vm8, %v309_v60  ;;  %785 = vmatmul.mubr.msk.f32.gmra.mrb[2].mxu1 %vm316_vm8, %v313_v61 }
  0x38   : > { %417 = vmatprep.mubr.f32.mxu0 %v942_v1  ;;  %441 = vmatprep.mubr.f32.mxu1 %v942_v1 }
  0x3b   : > { %782 = vmatmul.mubr.msk.f32.gmra.mrb[4].mxu0 %vm316_vm8, %v310_v62  ;;  %786 = vmatmul.mubr.msk.f32.gmra.mrb[4].mxu1 %vm316_vm8, %v314_v63 }
  0x3c   : > { %423 = vmatprep.mubr.f32.mxu0 %v942_v1  ;;  %447 = vmatprep.mubr.f32.mxu1 %v942_v1  ;;  %v226_v1 = vadd.f32 %v222_v8, %v203_v15  ;;  %v476_v15 = vsel %vm462_vm9, %v471_v24, 0.0 }
  0x3d   : > { %v506_v30 = vadd.f32 %v502_v25, %v476_v15 }
  0x3e   : > { %v240_v17 = vfloor.f32 %v226_v1 }
  0x3f   : > { %783 = vmatmul.mubr.msk.f32.gmra.mrb[6].mxu0 %vm316_vm8, %v311_v2  ;;  %787 = vmatmul.mubr.msk.f32.gmra.mrb[6].mxu1 %vm316_vm8, %v315_v3 }
  0x40   : > { %v244_v21 = vsub.f32 %v226_v1, %v240_v17  ;;  %v481_v22 = vadd.f32 1.0, %v240_v17  ;;  %v461_v12 = vrot.slane %v240_v17, %v1047_v23 }
  0x42   : > { %v467_v11 = vsub.f32 1.0, %v244_v21  ;;  %v489_v14 = vrot.slane %v481_v22, %v1047_v23  ;;  %v501_v29 = vrot.slane %v244_v21, %v1047_v23  ;;  %vm463_vm13 = vcmp.eq.f32.partialorder %v1050_v26, %v461_v12 }
  0x43   : > { %vm465_vm15 = vcmp.eq.f32.partialorder %v1052_v27, %v461_v12 }
  0x44   : > { %v475_v28 = vrot.slane %v467_v11, %v1047_v23  ;;  %vm491_vm14 = vcmp.eq.f32.partialorder %v1050_v26, %v489_v14  ;;  %vm493_vm0 = vcmp.eq.f32.partialorder %v1052_v27, %v489_v14 }
  0x45   : > { %v503_v34 = vsel %vm491_vm14, %v501_v29, 0.0  ;;  %v505_v36 = vsel %vm493_vm0, %v501_v29, 0.0 }
  0x46   : > { %v477_v33 = vsel %vm463_vm13, %v475_v28, 0.0  ;;  %v479_v35 = vsel %vm465_vm15, %v475_v28, 0.0 }
  0x47   : > { %v507_v43 = vadd.f32 %v503_v34, %v477_v33  ;;  %v509_v26 = vadd.f32 %v505_v36, %v479_v35 }
 0x106   : > { %v407_v23 = vpop.f32.mrb[0].mxu0  ;;  %v431_v37 = vpop.f32.mrb[0].mxu1 }
 0x107   : > { %v510_v38 = vmul.f32 %v506_v30, %v407_v23  ;;  %v589_v39 = vmul.f32 %v506_v30, %v431_v37  ;;  %v409_v40 = vpop.f32.mrb[1].mxu0  ;;  %v433_v41 = vpop.f32.mrb[1].mxu1 }
 0x108   : > { %v511_v51 = vmul.f32 %v507_v43, %v409_v40  ;;  %v590_v52 = vmul.f32 %v507_v43, %v433_v41 }
 0x10a   : > { %v413_v46 = vpop.f32.mrb[2].mxu0  ;;  %v437_v27 = vpop.f32.mrb[2].mxu1 }
 0x10b   : > { %v512_v47 = vmul.f32 %v508_v42, %v413_v46  ;;  %v591_v48 = vmul.f32 %v508_v42, %v437_v27  ;;  %v415_v49 = vpop.f32.mrb[3].mxu0  ;;  %v439_v50 = vpop.f32.mrb[3].mxu1 }
 0x10c   : > { %v513_v53 = vmul.f32 %v509_v26, %v415_v49  ;;  %v592_v54 = vmul.f32 %v509_v26, %v439_v50 }
 0x10d   : > { %v514_v55 = vadd.f32 %v512_v47, %v510_v38  ;;  %v593_v56 = vadd.f32 %v591_v48, %v589_v39 }
 0x10e   : > { %v521_v58 = vadd.f32 %v513_v53, %v511_v51  ;;  %v600_v59 = vadd.f32 %v592_v54, %v590_v52  ;;  %v419_v60 = vpop.f32.mrb[4].mxu0  ;;  %v443_v61 = vpop.f32.mrb[4].mxu1 }
 0x10f   : > { %v515_v62 = vrot.slane %v514_v55, 4  ;;  %v594_v63 = vrot.slane %v593_v56, 4  ;;  %v551_v2 = vmul.f32 %v506_v30, %v419_v60  ;;  %v627_v3 = vmul.f32 %v506_v30, %v443_v61  ;;  %v421_v5 = vpop.f32.mrb[5].mxu0  ;;  %v445_v6 = vpop.f32.mrb[5].mxu1 }
 0x110   : > { %v522_v7 = vrot.slane %v521_v58, 4  ;;  %v601_v8 = vrot.slane %v600_v59, 4  ;;  %v552_v18 = vmul.f32 %v507_v43, %v421_v5  ;;  %v628_v19 = vmul.f32 %v507_v43, %v445_v6 }
 0x111   : > { %v516_v10 = vadd.f32 %v515_v62, %v514_v55  ;;  %v595_v1 = vadd.f32 %v594_v63, %v593_v56 }
 0x112   : > { %v523_v16 = vadd.f32 %v522_v7, %v521_v58  ;;  %v602_v17 = vadd.f32 %v601_v8, %v600_v59  ;;  %v425_v20 = vpop.f32.mrb[6].mxu0  ;;  %v449_v21 = vpop.f32.mrb[6].mxu1 }
 0x113   : > { %v517_v22 = vrot.slane %v516_v10, 2  ;;  %v596_v24 = vrot.slane %v595_v1, 2  ;;  %v553_v9 = vmul.f32 %v508_v42, %v425_v20  ;;  %v629_v11 = vmul.f32 %v508_v42, %v449_v21  ;;  %v427_v12 = vpop.f32.mrb[7].mxu0  ;;  %v451_v14 = vpop.f32.mrb[7].mxu1 }
 0x114   : > { %v524_v15 = vrot.slane %v523_v16, 2  ;;  %v603_v25 = vrot.slane %v602_v17, 2  ;;  %v554_v28 = vmul.f32 %v509_v26, %v427_v12  ;;  %v630_v29 = vmul.f32 %v509_v26, %v451_v14 }
 0x115   : > { %v518_v30 = vadd.f32 %v517_v22, %v516_v10  ;;  %v597_v31 = vadd.f32 %v596_v24, %v595_v1  ;;  %v555_v4 = vadd.f32 %v553_v9, %v551_v2  ;;  %v631_v32 = vadd.f32 %v629_v11, %v627_v3 }
 0x116   : > { %v525_v33 = vadd.f32 %v524_v15, %v523_v16  ;;  %v604_v34 = vadd.f32 %v603_v25, %v602_v17  ;;  %v562_v35 = vadd.f32 %v554_v28, %v552_v18  ;;  %v638_v36 = vadd.f32 %v630_v29, %v628_v19 }
 0x117   : > { %v519_v23 = vrot.slane %v518_v30, 1  ;;  %v598_v37 = vrot.slane %v597_v31, 1  ;;  %v556_v38 = vrot.slane %v555_v4, 4  ;;  %v632_v39 = vrot.slane %v631_v32, 4 }
 0x118   : > { %v526_v40 = vrot.slane %v525_v33, 1  ;;  %v605_v41 = vrot.slane %v604_v34, 1  ;;  %v563_v42 = vrot.slane %v562_v35, 4  ;;  %v639_v43 = vrot.slane %v638_v36, 4 }
 0x119   : > { %v520_v44 = vadd.f32 %v519_v23, %v518_v30  ;;  %v599_v26 = vadd.f32 %v598_v37, %v597_v31  ;;  %v557_v45 = vadd.f32 %v556_v38, %v555_v4  ;;  %v633_v46 = vadd.f32 %v632_v39, %v631_v32 }
 0x11a   : > { %v527_v27 = vadd.f32 %v526_v40, %v525_v33  ;;  %v606_v47 = vadd.f32 %v605_v41, %v604_v34  ;;  %v564_v48 = vadd.f32 %v563_v42, %v562_v35  ;;  %v640_v49 = vadd.f32 %v639_v43, %v638_v36 }
 0x11b   : > { %v558_v50 = vrot.slane %v557_v45, 2  ;;  %v634_v51 = vrot.slane %v633_v46, 2 }
 0x11c   : > { %v530_v52 = vcombine.low %v520_v44, %v527_v27  ;;  %v609_v53 = vcombine.low %v599_v26, %v606_v47  ;;  %v565_v54 = vrot.slane %v564_v48, 2  ;;  %v641_v55 = vrot.slane %v640_v49, 2 }
 0x11d   : > { %v559_v56 = vadd.f32 %v558_v50, %v557_v45  ;;  %v635_v57 = vadd.f32 %v634_v51, %v633_v46 }
 0x11e   : > { %v537_v58 = vrot.slane %v530_v52, %v1121_v13  ;;  %v616_v59 = vrot.slane %v609_v53, %v1121_v13  ;;  %v566_v60 = vadd.f32 %v565_v54, %v564_v48  ;;  %v642_v61 = vadd.f32 %v641_v55, %v640_v49 }
 0x11f   : > { %v560_v62 = vrot.slane %v559_v56, 1  ;;  %v636_v63 = vrot.slane %v635_v57, 1 }
 0x120   : > { %v544_v3 = vrot.slane %v537_v58, %v1121_v13  ;;  %v623_v5 = vrot.slane %v616_v59, %v1121_v13  ;;  %v567_v6 = vrot.slane %v566_v60, 1  ;;  %v643_v7 = vrot.slane %v642_v61, 1 }
 0x121   : > { %v561_v8 = vadd.f32 %v560_v62, %v559_v56  ;;  %v637_v10 = vadd.f32 %v636_v63, %v635_v57 }
 0x122   : > { %v568_v1 = vadd.f32 %v567_v6, %v566_v60  ;;  %v644_v16 = vadd.f32 %v643_v7, %v642_v61  ;;  %550 = vst.msk [vmem:[%s176_s6] ss:$4 sm:$0x3] %vm1129_vm1, %v544_v3  ;;  %789 = vst.msk [vmem:[%s176_s6 + $0x2] ss:$4 sm:$0x3] %vm1129_vm1, %v623_v5 }
 0x124   : > { %v571_v0 = vcombine.low %v561_v8, %v568_v1  ;;  %v647_v17 = vcombine.low %v637_v10, %v644_v16 }
 0x126   : > { %v578_v18 = vrot.slane %v571_v0, %v1121_v13  ;;  %v654_v19 = vrot.slane %v647_v17, %v1121_v13 }
 0x128   : > { %v585_v20 = vrot.slane %v578_v18, %v1121_v13  ;;  %v661_v21 = vrot.slane %v654_v19, %v1121_v13 }
 0x12a   : > { %788 = vst.msk [vmem:[%s176_s6 + $0x1] ss:$4 sm:$0x3] %vm1129_vm1, %v585_v20  ;;  %790 = vst.msk [vmem:[%s176_s6 + $0x3] ss:$4 sm:$0x3] %vm1129_vm1, %v661_v21 }
 0x12b   : > { %875 = shalt.err (!%p872_p5)
}
 0x12c   : > { %s876_s26 = scalar_lea.hbm %s1147_s18, 128  ;;  %s880_s29 = scalar_lea.hbm %s1202_s2, 256 }
 0x12d   : > { %p877_p6 = scmp.ne.s32.totalorder %s1147_s18, %s876_s26  ;;  %p881_p10 = scmp.lt.u32.totalorder %s1147_s18, %s1202_s2 }
 0x12e   : > { %p882_p11 = scmp.lt.u32.totalorder %s880_s29, %s876_s26  ;;  %p884_p13 = scmp.lt.u32.totalorder %s876_s26, %s1147_s18 }
 0x12f   : > { %p878_p7 = pnand %p877_p6, %p1000_p4 }
 0x130   : > { %p883_p12 = por %p882_p11, %p881_p10 }
 0x131   : > { %p879_p9 = pneg %p878_p7 }
 0x132   : > { %p885_p0 = por %p884_p13, %p883_p12 }
 0x134   : > { %p886_p1 = pnand %p885_p0, %p879_p9 }
 0x136   : > { %889 = shalt.err (!%p886_p1)
}
 0x137   : > { %805 = dma.vmem_to_hbm [thread:$0]  (%p1000_p4), %s1149_s8, 128, %s1147_s18, %s666_s12  }
 0x138 PF: > { %p811_p2 = scmp.ge.s32.totalorder %s940_s14, 2  ;;  %s694_s4 = sand.u32 1, %s920_s9  }
 0x139   : > { %s695_s5 = scalar_lea.sflag [#allocation3], %s694_s4 }
 0x13a   : > { %p808_p3 = pnand %p811_p2, %p1007_p8 }
 0x13c   : > { %915 = dma.done.wait (!%p808_p3), %s695_s5, 128  }
 0x13d   : > { %917 = vsyncadd (!%p808_p3), %s695_s5, 4294967168  ;;  %s15_s14 = sadd.s32 1, %s940_s14   ;;  %s1207_s9 = smov %s924_s10 }
 0x13e   : > { %p12_p5 = scmp.ge.s32.totalorder %s15_s14, 4   ;;  %s1208_s10 = smov %s928_s11 }
 0x13f   : > { %s1209_s11 = smov %s1013_s22  ;;  %s1210_s12 = smov %s936_s13 }
 0x140   : > { %s1211_s13 = smov %s1213_s17  ;;  %14 = sbr.rel (!%p12_p5) target bundleno = 4 (0x4), region = 69 }
 0x147   :  { %700 = vsyncpa [#allocation3], 1 }
 0x148   :  { %702 = vsyncpa [#allocation3 + $0x1], 1 }

</bundles_post_ra>
